<compile_context>
chip_gen: v6e
topology: v6e:2x2x1
jax: 0.10.0
libtpu: 0.0.40
codegen_flags: <defaults>
</compile_context>

<pallas_src>
import math
import jax
import jax.numpy as jnp
from jax.experimental import pallas as pl
from jax.experimental.pallas import tpu as pltpu


def transformer_block(x, params, *, heads):
    """Pallas implementation of AudioTransformerBlock.forward."""
    B, S, D = x.shape
    hd = D // heads
    FF = params["w1"].shape[1]
    scale = 1.0 / math.sqrt(hd)
    eps = 1e-5
    bf16, f32 = jnp.bfloat16, jnp.float32

    # ---- host-side (free) weight prep: per-head-batched projection weights in bf16 ----
    def per_head_in(w):               # (D, heads*hd) -> (heads, D, hd)
        return w.reshape(D, heads, hd).transpose(1, 0, 2).astype(bf16)

    def per_head_bias(b):             # (heads*hd,) -> (heads, 1, hd)
        return b.astype(f32).reshape(heads, 1, hd)

    prepped = [
        per_head_in(params["wq"]), per_head_in(params["wk"]), per_head_in(params["wv"]),
        per_head_bias(params["bq"]), per_head_bias(params["bk"]), per_head_bias(params["bv"]),
        params["wo"].reshape(heads, hd, D).astype(bf16),      # head-merge folded into Wo
        params["bo"].astype(f32).reshape(1, D),
        params["ln1w"].astype(f32).reshape(1, D), params["ln1b"].astype(f32).reshape(1, D),
        params["w1"].astype(bf16), params["b1"].astype(f32).reshape(1, FF),
        params["w2"].astype(bf16), params["b2"].astype(f32).reshape(1, D),
        params["ln2w"].astype(f32).reshape(1, D), params["ln2b"].astype(f32).reshape(1, D),
    ]

    def kernel(x_ref, wq_ref, wk_ref, wv_ref, bq_ref, bk_ref, bv_ref,
               wo_ref, bo_ref, ln1w_ref, ln1b_ref, w1_ref, b1_ref,
               w2_ref, b2_ref, ln2w_ref, ln2b_ref, o_ref):
        xb = x_ref[0]                                        # (S, D) f32
        x_bf = xb.astype(bf16)
        xh = jnp.broadcast_to(x_bf, (heads, S, D))           # heads = leading batch dim

        # Batched per-head QKV projections: (heads,S,D) @ (heads,D,hd) -> (heads,S,hd), f32 acc.
        def proj(w_ref, b_ref):
            return jnp.einsum("hsd,hde->hse", xh, w_ref[...],
                              preferred_element_type=f32) + b_ref[...]

        q = proj(wq_ref, bq_ref)
        k = proj(wk_ref, bk_ref)
        v = proj(wv_ref, bv_ref)

        # Attention scores: single batched contraction; k-transpose folded into the MXU.
        s = jnp.einsum("hqe,hke->hqk", q.astype(bf16), k.astype(bf16),
                       preferred_element_type=f32) * scale   # (heads, S, S)
        m = jnp.max(s, axis=-1, keepdims=True)
        p = jnp.exp(s - m)                                   # f32 softmax numerator
        l = jnp.sum(p, axis=-1, keepdims=True)
        o = jnp.einsum("hqk,hke->hqe", p.astype(bf16), v.astype(bf16),
                       preferred_element_type=f32)           # (heads, S, hd)
        o = o * pl.reciprocal(l, approx=True)                # softmax denom on the EUP

        # Output projection with head-merge folded into Wo: per-head partials, summed over h.
        attn = jnp.einsum("hse,hed->hsd", o.astype(bf16), wo_ref[...],
                          preferred_element_type=f32)        # (heads, S, D)
        attn = jnp.sum(attn, axis=0) + bo_ref[...]           # (S, D)

        def layer_norm(h, w, b):
            mu = jnp.mean(h, axis=-1, keepdims=True)
            var = jnp.mean(jnp.square(h - mu), axis=-1, keepdims=True)
            return (h - mu) * jax.lax.rsqrt(var + eps) * w + b

        x1 = layer_norm(xb + attn, ln1w_ref[...], ln1b_ref[...])

        # Feed-forward: Linear -> ReLU -> Linear (bf16 operands, f32 accumulation).
        h1 = jnp.dot(x1.astype(bf16), w1_ref[...], preferred_element_type=f32) + b1_ref[...]
        h1 = jnp.maximum(h1, 0.0)
        ff = jnp.dot(h1.astype(bf16), w2_ref[...], preferred_element_type=f32) + b2_ref[...]

        o_ref[0] = layer_norm(x1 + ff, ln2w_ref[...], ln2b_ref[...])

    def const_spec(a):
        # Full-array block, constant index map -> no re-fetch across grid steps.
        return pl.BlockSpec(a.shape, lambda b, _n=a.ndim: (0,) * _n)

    in_specs = [pl.BlockSpec((1, S, D), lambda b: (b, 0, 0))]
    in_specs += [const_spec(p) for p in prepped]

    flops = 2 * B * S * D * (4 * D + 2 * FF) + 4 * B * S * S * D
    transcendentals = B * heads * S * S + B * heads * S + 4 * B * S
    bytes_accessed = int(2 * B * S * D * 4
                         + sum(int(p.size) * p.dtype.itemsize for p in prepped))

    return pl.pallas_call(
        kernel,
        out_shape=jax.ShapeDtypeStruct((B, S, D), jnp.float32),
        grid=(B,),
        in_specs=in_specs,
        out_specs=pl.BlockSpec((1, S, D), lambda b: (b, 0, 0)),
        compiler_params=pltpu.CompilerParams(
            dimension_semantics=("parallel",)),
        cost_estimate=pl.CostEstimate(flops=flops,
                                      transcendentals=transcendentals,
                                      bytes_accessed=bytes_accessed),
    )(x, *prepped)


def reference(x, params, *, heads):
    """Pure-JAX f32 reference mirroring PyTorch nn.MultiheadAttention + FF + LayerNorm."""
    B, S, D = x.shape
    hd = D // heads
    q = x @ params["wq"] + params["bq"]
    k = x @ params["wk"] + params["bk"]
    v = x @ params["wv"] + params["bv"]

    def split(t):
        return t.reshape(B, S, heads, hd).transpose(0, 2, 1, 3)

    qh, kh, vh = split(q), split(k), split(v)
    s = jnp.einsum("bhqd,bhkd->bhqk", qh, kh) / jnp.sqrt(jnp.float32(hd))
    p = jax.nn.softmax(s, axis=-1)
    o = jnp.einsum("bhqk,bhkd->bhqd", p, vh).transpose(0, 2, 1, 3).reshape(B, S, D)
    attn = o @ params["wo"] + params["bo"]

    def ln(h, w, b):
        mu = h.mean(-1, keepdims=True)
        var = ((h - mu) ** 2).mean(-1, keepdims=True)
        return (h - mu) / jnp.sqrt(var + 1e-5) * w + b

    x1 = ln(x + attn, params["ln1w"], params["ln1b"])
    h1 = jax.nn.relu(x1 @ params["w1"] + params["b1"])
    ff = h1 @ params["w2"] + params["b2"]
    return ln(x1 + ff, params["ln2w"], params["ln2b"])


def init_params(key, dim, heads, ff_dim):
    ks = jax.random.split(key, 12)
    std = 0.05
    f32 = jnp.float32
    # Linear weights stored pre-transposed: (in_features, out_features).
    return {
        "wq": std * jax.random.normal(ks[0], (dim, dim), f32),
        "wk": std * jax.random.normal(ks[1], (dim, dim), f32),
        "wv": std * jax.random.normal(ks[2], (dim, dim), f32),
        "bq": std * jax.random.normal(ks[3], (dim,), f32),
        "bk": std * jax.random.normal(ks[4], (dim,), f32),
        "bv": std * jax.random.normal(ks[5], (dim,), f32),
        "wo": std * jax.random.normal(ks[6], (dim, dim), f32),
        "bo": std * jax.random.normal(ks[7], (dim,), f32),
        "ln1w": 1.0 + 0.1 * jax.random.normal(ks[8], (dim,), f32),
        "ln1b": 0.1 * jax.random.normal(ks[9], (dim,), f32),
        "w1": std * jax.random.normal(ks[10], (dim, ff_dim), f32),
        "b1": jnp.zeros((ff_dim,), f32),
        "w2": std * jax.random.normal(ks[11], (ff_dim, dim), f32),
        "b2": jnp.zeros((dim,), f32),
        "ln2w": jnp.ones((dim,), f32),
        "ln2b": jnp.zeros((dim,), f32),
    }


if __name__ == "__main__":
    B, S, D, HEADS, FF = 2, 8, 32, 4, 64
    key = jax.random.PRNGKey(0)
    kx, kp = jax.random.split(key)
    x = jax.random.normal(kx, (B, S, D), jnp.float32)
    params = init_params(kp, D, HEADS, FF)

    out = jax.block_until_ready(transformer_block(x, params, heads=HEADS))

    with jax.default_matmul_precision("highest"):
        ref = jax.block_until_ready(reference(x, params, heads=HEADS))

    assert out.shape == (B, S, D)
    # bf16 MXU operands + approx softmax reciprocal vs the f32 reference: observed max-abs
    # error ~1e-3 at these shapes; tolerance leaves headroom across TPU generations.
    err = float(jnp.max(jnp.abs(out - ref)))
    assert jnp.allclose(out, ref, atol=2e-2, rtol=2e-2), err
    print("KERNEL_OK")
</pallas_src>

<mosaic_0001>
module attributes {stable_mosaic.version = 11 : i64} {
  func.func @kernel(%arg0: i32, %arg1: memref<1x8x32xf32, #tpu.memory_space<vmem>>, %arg2: memref<4x32x8xbf16, #tpu.memory_space<vmem>>, %arg3: memref<4x32x8xbf16, #tpu.memory_space<vmem>>, %arg4: memref<4x32x8xbf16, #tpu.memory_space<vmem>>, %arg5: memref<4x1x8xf32, #tpu.memory_space<vmem>>, %arg6: memref<4x1x8xf32, #tpu.memory_space<vmem>>, %arg7: memref<4x1x8xf32, #tpu.memory_space<vmem>>, %arg8: memref<4x8x32xbf16, #tpu.memory_space<vmem>>, %arg9: memref<1x32xf32, #tpu.memory_space<vmem>>, %arg10: memref<1x32xf32, #tpu.memory_space<vmem>>, %arg11: memref<1x32xf32, #tpu.memory_space<vmem>>, %arg12: memref<32x64xbf16, #tpu.memory_space<vmem>>, %arg13: memref<1x64xf32, #tpu.memory_space<vmem>>, %arg14: memref<64x32xbf16, #tpu.memory_space<vmem>>, %arg15: memref<1x32xf32, #tpu.memory_space<vmem>>, %arg16: memref<1x32xf32, #tpu.memory_space<vmem>>, %arg17: memref<1x32xf32, #tpu.memory_space<vmem>>, %arg18: memref<1x8x32xf32, #tpu.memory_space<vmem>>) attributes {dimension_semantics = [#tpu.dimension_semantics<parallel>], iteration_bounds = array<i64: 2>, scalar_prefetch = 0 : i64, scratch_operands = 0 : i64, tpu.core_type = #tpu.core_type<tc>, window_params = [{transform_indices = @transform_0, window_bounds = array<i64: 1, 8, 32>}, {pipeline_mode = #tpu.pipeline_mode<synchronous>, transform_indices = @transform_1, window_bounds = array<i64: 4, 32, 8>}, {pipeline_mode = #tpu.pipeline_mode<synchronous>, transform_indices = @transform_2, window_bounds = array<i64: 4, 32, 8>}, {pipeline_mode = #tpu.pipeline_mode<synchronous>, transform_indices = @transform_3, window_bounds = array<i64: 4, 32, 8>}, {pipeline_mode = #tpu.pipeline_mode<synchronous>, transform_indices = @transform_4, window_bounds = array<i64: 4, 1, 8>}, {pipeline_mode = #tpu.pipeline_mode<synchronous>, transform_indices = @transform_5, window_bounds = array<i64: 4, 1, 8>}, {pipeline_mode = #tpu.pipeline_mode<synchronous>, transform_indices = @transform_6, window_bounds = array<i64: 4, 1, 8>}, {pipeline_mode = #tpu.pipeline_mode<synchronous>, transform_indices = @transform_7, window_bounds = array<i64: 4, 8, 32>}, {pipeline_mode = #tpu.pipeline_mode<synchronous>, transform_indices = @transform_8, window_bounds = array<i64: 1, 32>}, {pipeline_mode = #tpu.pipeline_mode<synchronous>, transform_indices = @transform_9, window_bounds = array<i64: 1, 32>}, {pipeline_mode = #tpu.pipeline_mode<synchronous>, transform_indices = @transform_10, window_bounds = array<i64: 1, 32>}, {pipeline_mode = #tpu.pipeline_mode<synchronous>, transform_indices = @transform_11, window_bounds = array<i64: 32, 64>}, {pipeline_mode = #tpu.pipeline_mode<synchronous>, transform_indices = @transform_12, window_bounds = array<i64: 1, 64>}, {pipeline_mode = #tpu.pipeline_mode<synchronous>, transform_indices = @transform_13, window_bounds = array<i64: 64, 32>}, {pipeline_mode = #tpu.pipeline_mode<synchronous>, transform_indices = @transform_14, window_bounds = array<i64: 1, 32>}, {pipeline_mode = #tpu.pipeline_mode<synchronous>, transform_indices = @transform_15, window_bounds = array<i64: 1, 32>}, {pipeline_mode = #tpu.pipeline_mode<synchronous>, transform_indices = @transform_16, window_bounds = array<i64: 1, 32>}, {transform_indices = @transform_17, window_bounds = array<i64: 1, 8, 32>}]} {
    %c0 = arith.constant 0 : index
    %c0_0 = arith.constant 0 : index
    %c0_1 = arith.constant 0 : index
    %0 = vector.load %arg1[%c0, %c0_0, %c0_1] : memref<1x8x32xf32, #tpu.memory_space<vmem>>, vector<1x8x32xf32>
    %1 = vector.shape_cast %0 : vector<1x8x32xf32> to vector<8x32xf32>
    %2 = arith.truncf %1 : vector<8x32xf32> to vector<8x32xbf16>
    %3 = vector.shape_cast %2 : vector<8x32xbf16> to vector<1x8x32xbf16>
    %4 = vector.broadcast %3 : vector<1x8x32xbf16> to vector<4x8x32xbf16>
    %c0_2 = arith.constant 0 : index
    %c0_3 = arith.constant 0 : index
    %c0_4 = arith.constant 0 : index
    %5 = vector.load %arg2[%c0_2, %c0_3, %c0_4] : memref<4x32x8xbf16, #tpu.memory_space<vmem>>, vector<4x32x8xbf16>
    "tpu.trace_start"() <{level = 10 : i32, message = "hsd,hde->hse"}> : () -> ()
    %cst = arith.constant dense<0.000000e+00> : vector<4x8x8xf32>
    %6 = tpu.matmul %4, %5, %cst {dimension_numbers = #tpu.dot_dimension_numbers<[2], [1], [1], [2], [0, 0, 0, 1, 1, 2], [0], [0]>} : vector<4x8x32xbf16>, vector<4x32x8xbf16>, vector<4x8x8xf32> -> vector<4x8x8xf32>
    "tpu.trace_stop"() : () -> ()
    %c0_5 = arith.constant 0 : index
    %c0_6 = arith.constant 0 : index
    %c0_7 = arith.constant 0 : index
    %7 = vector.load %arg5[%c0_5, %c0_6, %c0_7] : memref<4x1x8xf32, #tpu.memory_space<vmem>>, vector<4x1x8xf32>
    %8 = vector.broadcast %7 : vector<4x1x8xf32> to vector<4x8x8xf32>
    %9 = arith.addf %6, %8 : vector<4x8x8xf32>
    %c0_8 = arith.constant 0 : index
    %c0_9 = arith.constant 0 : index
    %c0_10 = arith.constant 0 : index
    %10 = vector.load %arg3[%c0_8, %c0_9, %c0_10] : memref<4x32x8xbf16, #tpu.memory_space<vmem>>, vector<4x32x8xbf16>
    "tpu.trace_start"() <{level = 10 : i32, message = "hsd,hde->hse"}> : () -> ()
    %cst_11 = arith.constant dense<0.000000e+00> : vector<4x8x8xf32>
    %11 = tpu.matmul %4, %10, %cst_11 {dimension_numbers = #tpu.dot_dimension_numbers<[2], [1], [1], [2], [0, 0, 0, 1, 1, 2], [0], [0]>} : vector<4x8x32xbf16>, vector<4x32x8xbf16>, vector<4x8x8xf32> -> vector<4x8x8xf32>
    "tpu.trace_stop"() : () -> ()
    %c0_12 = arith.constant 0 : index
    %c0_13 = arith.constant 0 : index
    %c0_14 = arith.constant 0 : index
    %12 = vector.load %arg6[%c0_12, %c0_13, %c0_14] : memref<4x1x8xf32, #tpu.memory_space<vmem>>, vector<4x1x8xf32>
    %13 = vector.broadcast %12 : vector<4x1x8xf32> to vector<4x8x8xf32>
    %14 = arith.addf %11, %13 : vector<4x8x8xf32>
    %c0_15 = arith.constant 0 : index
    %c0_16 = arith.constant 0 : index
    %c0_17 = arith.constant 0 : index
    %15 = vector.load %arg4[%c0_15, %c0_16, %c0_17] : memref<4x32x8xbf16, #tpu.memory_space<vmem>>, vector<4x32x8xbf16>
    "tpu.trace_start"() <{level = 10 : i32, message = "hsd,hde->hse"}> : () -> ()
    %cst_18 = arith.constant dense<0.000000e+00> : vector<4x8x8xf32>
    %16 = tpu.matmul %4, %15, %cst_18 {dimension_numbers = #tpu.dot_dimension_numbers<[2], [1], [1], [2], [0, 0, 0, 1, 1, 2], [0], [0]>} : vector<4x8x32xbf16>, vector<4x32x8xbf16>, vector<4x8x8xf32> -> vector<4x8x8xf32>
    "tpu.trace_stop"() : () -> ()
    %c0_19 = arith.constant 0 : index
    %c0_20 = arith.constant 0 : index
    %c0_21 = arith.constant 0 : index
    %17 = vector.load %arg7[%c0_19, %c0_20, %c0_21] : memref<4x1x8xf32, #tpu.memory_space<vmem>>, vector<4x1x8xf32>
    %18 = vector.broadcast %17 : vector<4x1x8xf32> to vector<4x8x8xf32>
    %19 = arith.addf %16, %18 : vector<4x8x8xf32>
    %20 = arith.truncf %9 : vector<4x8x8xf32> to vector<4x8x8xbf16>
    %21 = arith.truncf %14 : vector<4x8x8xf32> to vector<4x8x8xbf16>
    "tpu.trace_start"() <{level = 10 : i32, message = "hqe,hke->hqk"}> : () -> ()
    %cst_22 = arith.constant dense<0.000000e+00> : vector<4x8x8xf32>
    %22 = tpu.matmul %20, %21, %cst_22 {dimension_numbers = #tpu.dot_dimension_numbers<[2], [2], [1], [1], [0, 0, 0, 1, 1, 1], [0], [0]>} : vector<4x8x8xbf16>, vector<4x8x8xbf16>, vector<4x8x8xf32> -> vector<4x8x8xf32>
    "tpu.trace_stop"() : () -> ()
    %cst_23 = arith.constant 0.353553385 : f32
    %23 = vector.broadcast %cst_23 : f32 to vector<4x8x8xf32>
    %24 = arith.mulf %22, %23 : vector<4x8x8xf32>
    %cst_24 = arith.constant dense<0xFF800000> : vector<4x8xf32>
    %25 = vector.multi_reduction <maximumf>, %24, %cst_24 [2] : vector<4x8x8xf32> to vector<4x8xf32>
    %26 = vector.shape_cast %25 : vector<4x8xf32> to vector<4x8x1xf32>
    %27 = vector.broadcast %26 : vector<4x8x1xf32> to vector<4x8x8xf32>
    %28 = arith.subf %24, %27 : vector<4x8x8xf32>
    %29 = math.exp %28 : vector<4x8x8xf32>
    %cst_25 = arith.constant dense<0.000000e+00> : vector<4x8xf32>
    %30 = vector.multi_reduction <add>, %29, %cst_25 [2] : vector<4x8x8xf32> to vector<4x8xf32>
    %31 = vector.shape_cast %30 : vector<4x8xf32> to vector<4x8x1xf32>
    %32 = arith.truncf %29 : vector<4x8x8xf32> to vector<4x8x8xbf16>
    %33 = arith.truncf %19 : vector<4x8x8xf32> to vector<4x8x8xbf16>
    "tpu.trace_start"() <{level = 10 : i32, message = "hqk,hke->hqe"}> : () -> ()
    %cst_26 = arith.constant dense<0.000000e+00> : vector<4x8x8xf32>
    %34 = tpu.matmul %32, %33, %cst_26 {dimension_numbers = #tpu.dot_dimension_numbers<[2], [1], [1], [2], [0, 0, 0, 1, 1, 2], [0], [0]>} : vector<4x8x8xbf16>, vector<4x8x8xbf16>, vector<4x8x8xf32> -> vector<4x8x8xf32>
    "tpu.trace_stop"() : () -> ()
    %35 = tpu.reciprocal %31 {approx = true} : vector<4x8x1xf32> -> vector<4x8x1xf32>
    %36 = vector.broadcast %35 : vector<4x8x1xf32> to vector<4x8x8xf32>
    %37 = arith.mulf %34, %36 : vector<4x8x8xf32>
    %38 = arith.truncf %37 : vector<4x8x8xf32> to vector<4x8x8xbf16>
    %c0_27 = arith.constant 0 : index
    %c0_28 = arith.constant 0 : index
    %c0_29 = arith.constant 0 : index
    %39 = vector.load %arg8[%c0_27, %c0_28, %c0_29] : memref<4x8x32xbf16, #tpu.memory_space<vmem>>, vector<4x8x32xbf16>
    "tpu.trace_start"() <{level = 10 : i32, message = "hse,hed->hsd"}> : () -> ()
    %cst_30 = arith.constant dense<0.000000e+00> : vector<4x8x32xf32>
    %40 = tpu.matmul %38, %39, %cst_30 {dimension_numbers = #tpu.dot_dimension_numbers<[2], [1], [1], [2], [0, 0, 0, 1, 1, 2], [0], [0]>} : vector<4x8x8xbf16>, vector<4x8x32xbf16>, vector<4x8x32xf32> -> vector<4x8x32xf32>
    "tpu.trace_stop"() : () -> ()
    %cst_31 = arith.constant dense<0.000000e+00> : vector<8x32xf32>
    %41 = vector.multi_reduction <add>, %40, %cst_31 [0] : vector<4x8x32xf32> to vector<8x32xf32>
    %c0_32 = arith.constant 0 : index
    %c0_33 = arith.constant 0 : index
    %42 = vector.load %arg9[%c0_32, %c0_33] : memref<1x32xf32, #tpu.memory_space<vmem>>, vector<1x32xf32>
    %43 = vector.broadcast %42 : vector<1x32xf32> to vector<8x32xf32>
    %44 = arith.addf %41, %43 : vector<8x32xf32>
    %45 = arith.addf %1, %44 : vector<8x32xf32>
    %c0_34 = arith.constant 0 : index
    %c0_35 = arith.constant 0 : index
    %46 = vector.load %arg10[%c0_34, %c0_35] : memref<1x32xf32, #tpu.memory_space<vmem>>, vector<1x32xf32>
    %c0_36 = arith.constant 0 : index
    %c0_37 = arith.constant 0 : index
    %47 = vector.load %arg11[%c0_36, %c0_37] : memref<1x32xf32, #tpu.memory_space<vmem>>, vector<1x32xf32>
    %cst_38 = arith.constant dense<0.000000e+00> : vector<8xf32>
    %48 = vector.multi_reduction <add>, %45, %cst_38 [1] : vector<8x32xf32> to vector<8xf32>
    %49 = vector.shape_cast %48 : vector<8xf32> to vector<8x1xf32>
    %cst_39 = arith.constant 3.200000e+01 : f32
    %50 = vector.broadcast %cst_39 : f32 to vector<8x1xf32>
    %51 = arith.divf %49, %50 : vector<8x1xf32>
    %52 = vector.broadcast %51 : vector<8x1xf32> to vector<8x32xf32>
    %53 = arith.subf %45, %52 : vector<8x32xf32>
    %54 = arith.mulf %53, %53 : vector<8x32xf32>
    %cst_40 = arith.constant dense<0.000000e+00> : vector<8xf32>
    %55 = vector.multi_reduction <add>, %54, %cst_40 [1] : vector<8x32xf32> to vector<8xf32>
    %56 = vector.shape_cast %55 : vector<8xf32> to vector<8x1xf32>
    %cst_41 = arith.constant 3.200000e+01 : f32
    %57 = vector.broadcast %cst_41 : f32 to vector<8x1xf32>
    %58 = arith.divf %56, %57 : vector<8x1xf32>
    %59 = vector.broadcast %51 : vector<8x1xf32> to vector<8x32xf32>
    %60 = arith.subf %45, %59 : vector<8x32xf32>
    %cst_42 = arith.constant 9.99999974E-6 : f32
    %61 = vector.broadcast %cst_42 : f32 to vector<8x1xf32>
    %62 = arith.addf %58, %61 : vector<8x1xf32>
    %63 = math.rsqrt %62 : vector<8x1xf32>
    %64 = vector.broadcast %63 : vector<8x1xf32> to vector<8x32xf32>
    %65 = arith.mulf %60, %64 : vector<8x32xf32>
    %66 = vector.broadcast %46 : vector<1x32xf32> to vector<8x32xf32>
    %67 = arith.mulf %65, %66 : vector<8x32xf32>
    %68 = vector.broadcast %47 : vector<1x32xf32> to vector<8x32xf32>
    %69 = arith.addf %67, %68 : vector<8x32xf32>
    %70 = arith.truncf %69 : vector<8x32xf32> to vector<8x32xbf16>
    %c0_43 = arith.constant 0 : index
    %c0_44 = arith.constant 0 : index
    %71 = vector.load %arg12[%c0_43, %c0_44] : memref<32x64xbf16, #tpu.memory_space<vmem>>, vector<32x64xbf16>
    %cst_45 = arith.constant dense<0.000000e+00> : vector<8x64xf32>
    %72 = tpu.matmul %70, %71, %cst_45 {dimension_numbers = #tpu.dot_dimension_numbers<[1], [0], [0], [1], [0, 0, 1, 1], [], []>} : vector<8x32xbf16>, vector<32x64xbf16>, vector<8x64xf32> -> vector<8x64xf32>
    %c0_46 = arith.constant 0 : index
    %c0_47 = arith.constant 0 : index
    %73 = vector.load %arg13[%c0_46, %c0_47] : memref<1x64xf32, #tpu.memory_space<vmem>>, vector<1x64xf32>
    %74 = vector.broadcast %73 : vector<1x64xf32> to vector<8x64xf32>
    %75 = arith.addf %72, %74 : vector<8x64xf32>
    %cst_48 = arith.constant 0.000000e+00 : f32
    %76 = vector.broadcast %cst_48 : f32 to vector<8x64xf32>
    %77 = arith.maximumf %75, %76 : vector<8x64xf32>
    %78 = arith.truncf %77 : vector<8x64xf32> to vector<8x64xbf16>
    %c0_49 = arith.constant 0 : index
    %c0_50 = arith.constant 0 : index
    %79 = vector.load %arg14[%c0_49, %c0_50] : memref<64x32xbf16, #tpu.memory_space<vmem>>, vector<64x32xbf16>
    %cst_51 = arith.constant dense<0.000000e+00> : vector<8x32xf32>
    %80 = tpu.matmul %78, %79, %cst_51 {dimension_numbers = #tpu.dot_dimension_numbers<[1], [0], [0], [1], [0, 0, 1, 1], [], []>} : vector<8x64xbf16>, vector<64x32xbf16>, vector<8x32xf32> -> vector<8x32xf32>
    %c0_52 = arith.constant 0 : index
    %c0_53 = arith.constant 0 : index
    %81 = vector.load %arg15[%c0_52, %c0_53] : memref<1x32xf32, #tpu.memory_space<vmem>>, vector<1x32xf32>
    %82 = vector.broadcast %81 : vector<1x32xf32> to vector<8x32xf32>
    %83 = arith.addf %80, %82 : vector<8x32xf32>
    %84 = arith.addf %69, %83 : vector<8x32xf32>
    %c0_54 = arith.constant 0 : index
    %c0_55 = arith.constant 0 : index
    %85 = vector.load %arg16[%c0_54, %c0_55] : memref<1x32xf32, #tpu.memory_space<vmem>>, vector<1x32xf32>
    %c0_56 = arith.constant 0 : index
    %c0_57 = arith.constant 0 : index
    %86 = vector.load %arg17[%c0_56, %c0_57] : memref<1x32xf32, #tpu.memory_space<vmem>>, vector<1x32xf32>
    %cst_58 = arith.constant dense<0.000000e+00> : vector<8xf32>
    %87 = vector.multi_reduction <add>, %84, %cst_58 [1] : vector<8x32xf32> to vector<8xf32>
    %88 = vector.shape_cast %87 : vector<8xf32> to vector<8x1xf32>
    %cst_59 = arith.constant 3.200000e+01 : f32
    %89 = vector.broadcast %cst_59 : f32 to vector<8x1xf32>
    %90 = arith.divf %88, %89 : vector<8x1xf32>
    %91 = vector.broadcast %90 : vector<8x1xf32> to vector<8x32xf32>
    %92 = arith.subf %84, %91 : vector<8x32xf32>
    %93 = arith.mulf %92, %92 : vector<8x32xf32>
    %cst_60 = arith.constant dense<0.000000e+00> : vector<8xf32>
    %94 = vector.multi_reduction <add>, %93, %cst_60 [1] : vector<8x32xf32> to vector<8xf32>
    %95 = vector.shape_cast %94 : vector<8xf32> to vector<8x1xf32>
    %cst_61 = arith.constant 3.200000e+01 : f32
    %96 = vector.broadcast %cst_61 : f32 to vector<8x1xf32>
    %97 = arith.divf %95, %96 : vector<8x1xf32>
    %98 = vector.broadcast %90 : vector<8x1xf32> to vector<8x32xf32>
    %99 = arith.subf %84, %98 : vector<8x32xf32>
    %cst_62 = arith.constant 9.99999974E-6 : f32
    %100 = vector.broadcast %cst_62 : f32 to vector<8x1xf32>
    %101 = arith.addf %97, %100 : vector<8x1xf32>
    %102 = math.rsqrt %101 : vector<8x1xf32>
    %103 = vector.broadcast %102 : vector<8x1xf32> to vector<8x32xf32>
    %104 = arith.mulf %99, %103 : vector<8x32xf32>
    %105 = vector.broadcast %85 : vector<1x32xf32> to vector<8x32xf32>
    %106 = arith.mulf %104, %105 : vector<8x32xf32>
    %107 = vector.broadcast %86 : vector<1x32xf32> to vector<8x32xf32>
    %108 = arith.addf %106, %107 : vector<8x32xf32>
    %c0_63 = arith.constant 0 : index
    %c0_64 = arith.constant 0 : index
    %c0_65 = arith.constant 0 : index
    %109 = vector.load %arg18[%c0_63, %c0_64, %c0_65] : memref<1x8x32xf32, #tpu.memory_space<vmem>>, vector<1x8x32xf32>
    %110 = vector.shape_cast %109 : vector<1x8x32xf32> to vector<8x32xf32>
    %111 = vector.shape_cast %108 : vector<8x32xf32> to vector<1x8x32xf32>
    tpu.vector_store %arg18[%c0_63, %c0_64, %c0_65], %111 {strides = array<i32>} : memref<1x8x32xf32, #tpu.memory_space<vmem>>, vector<1x8x32xf32>,
    return
  }
  func.func @transform_0(%arg0: i32) -> (i32, i32, i32) {
    %c0_i32 = arith.constant 0 : i32
    %c0_i32_0 = arith.constant 0 : i32
    %c0_i32_1 = arith.constant 0 : i32
    return %arg0, %c0_i32, %c0_i32_0 : i32, i32, i32
  }
  func.func @transform_1(%arg0: i32) -> (i32, i32, i32) {
    %c0_i32 = arith.constant 0 : i32
    %c0_i32_0 = arith.constant 0 : i32
    %c0_i32_1 = arith.constant 0 : i32
    %c0_i32_2 = arith.constant 0 : i32
    return %c0_i32, %c0_i32_0, %c0_i32_1 : i32, i32, i32
  }
  func.func @transform_2(%arg0: i32) -> (i32, i32, i32) {
    %c0_i32 = arith.constant 0 : i32
    %c0_i32_0 = arith.constant 0 : i32
    %c0_i32_1 = arith.constant 0 : i32
    %c0_i32_2 = arith.constant 0 : i32
    return %c0_i32, %c0_i32_0, %c0_i32_1 : i32, i32, i32
  }
  func.func @transform_3(%arg0: i32) -> (i32, i32, i32) {
    %c0_i32 = arith.constant 0 : i32
    %c0_i32_0 = arith.constant 0 : i32
    %c0_i32_1 = arith.constant 0 : i32
    %c0_i32_2 = arith.constant 0 : i32
    return %c0_i32, %c0_i32_0, %c0_i32_1 : i32, i32, i32
  }
  func.func @transform_4(%arg0: i32) -> (i32, i32, i32) {
    %c0_i32 = arith.constant 0 : i32
    %c0_i32_0 = arith.constant 0 : i32
    %c0_i32_1 = arith.constant 0 : i32
    %c0_i32_2 = arith.constant 0 : i32
    return %c0_i32, %c0_i32_0, %c0_i32_1 : i32, i32, i32
  }
  func.func @transform_5(%arg0: i32) -> (i32, i32, i32) {
    %c0_i32 = arith.constant 0 : i32
    %c0_i32_0 = arith.constant 0 : i32
    %c0_i32_1 = arith.constant 0 : i32
    %c0_i32_2 = arith.constant 0 : i32
    return %c0_i32, %c0_i32_0, %c0_i32_1 : i32, i32, i32
  }
  func.func @transform_6(%arg0: i32) -> (i32, i32, i32) {
    %c0_i32 = arith.constant 0 : i32
    %c0_i32_0 = arith.constant 0 : i32
    %c0_i32_1 = arith.constant 0 : i32
    %c0_i32_2 = arith.constant 0 : i32
    return %c0_i32, %c0_i32_0, %c0_i32_1 : i32, i32, i32
  }
  func.func @transform_7(%arg0: i32) -> (i32, i32, i32) {
    %c0_i32 = arith.constant 0 : i32
    %c0_i32_0 = arith.constant 0 : i32
    %c0_i32_1 = arith.constant 0 : i32
    %c0_i32_2 = arith.constant 0 : i32
    return %c0_i32, %c0_i32_0, %c0_i32_1 : i32, i32, i32
  }
  func.func @transform_8(%arg0: i32) -> (i32, i32) {
    %c0_i32 = arith.constant 0 : i32
    %c0_i32_0 = arith.constant 0 : i32
    %c0_i32_1 = arith.constant 0 : i32
    return %c0_i32, %c0_i32_0 : i32, i32
  }
  func.func @transform_9(%arg0: i32) -> (i32, i32) {
    %c0_i32 = arith.constant 0 : i32
    %c0_i32_0 = arith.constant 0 : i32
    %c0_i32_1 = arith.constant 0 : i32
    return %c0_i32, %c0_i32_0 : i32, i32
  }
  func.func @transform_10(%arg0: i32) -> (i32, i32) {
    %c0_i32 = arith.constant 0 : i32
    %c0_i32_0 = arith.constant 0 : i32
    %c0_i32_1 = arith.constant 0 : i32
    return %c0_i32, %c0_i32_0 : i32, i32
  }
  func.func @transform_11(%arg0: i32) -> (i32, i32) {
    %c0_i32 = arith.constant 0 : i32
    %c0_i32_0 = arith.constant 0 : i32
    %c0_i32_1 = arith.constant 0 : i32
    return %c0_i32, %c0_i32_0 : i32, i32
  }
  func.func @transform_12(%arg0: i32) -> (i32, i32) {
    %c0_i32 = arith.constant 0 : i32
    %c0_i32_0 = arith.constant 0 : i32
    %c0_i32_1 = arith.constant 0 : i32
    return %c0_i32, %c0_i32_0 : i32, i32
  }
  func.func @transform_13(%arg0: i32) -> (i32, i32) {
    %c0_i32 = arith.constant 0 : i32
    %c0_i32_0 = arith.constant 0 : i32
    %c0_i32_1 = arith.constant 0 : i32
    return %c0_i32, %c0_i32_0 : i32, i32
  }
  func.func @transform_14(%arg0: i32) -> (i32, i32) {
    %c0_i32 = arith.constant 0 : i32
    %c0_i32_0 = arith.constant 0 : i32
    %c0_i32_1 = arith.constant 0 : i32
    return %c0_i32, %c0_i32_0 : i32, i32
  }
  func.func @transform_15(%arg0: i32) -> (i32, i32) {
    %c0_i32 = arith.constant 0 : i32
    %c0_i32_0 = arith.constant 0 : i32
    %c0_i32_1 = arith.constant 0 : i32
    return %c0_i32, %c0_i32_0 : i32, i32
  }
  func.func @transform_16(%arg0: i32) -> (i32, i32) {
    %c0_i32 = arith.constant 0 : i32
    %c0_i32_0 = arith.constant 0 : i32
    %c0_i32_1 = arith.constant 0 : i32
    return %c0_i32, %c0_i32_0 : i32, i32
  }
  func.func @transform_17(%arg0: i32) -> (i32, i32, i32) {
    %c0_i32 = arith.constant 0 : i32
    %c0_i32_0 = arith.constant 0 : i32
    %c0_i32_1 = arith.constant 0 : i32
    return %arg0, %c0_i32, %c0_i32_0 : i32, i32, i32
  }
}

</mosaic_0001>

<bundles_post_ra>
// kernel: tpu_custom_call.1
= control target key start
LH: loop header
LB: loop body
LE: loop exit
PB: predicated region body
PF: predicated region fallthrough
CT: control target
= control target key end

     0   :  { %s3235_s0 = inlined_call_operand.vmem [shape: f32[2,8,32], index: 0, kind: input, shape index: {}]   ;;  %s3236_s1 = inlined_call_operand.vmem [shape: bf16[4,32,8], index: 1, kind: input, shape index: {}]   ;;  %s3237_s2 = inlined_call_operand.vmem [shape: bf16[4,32,8], index: 2, kind: input, shape index: {}]   ;;  %s3238_s3 = inlined_call_operand.vmem [shape: bf16[4,32,8], index: 3, kind: input, shape index: {}]   ;;  %s3239_s4 = inlined_call_operand.vmem [shape: f32[4,1,8], index: 4, kind: input, shape index: {}]   ;;  %s3240_s5 = inlined_call_operand.vmem [shape: f32[4,1,8], index: 5, kind: input, shape index: {}]   ;;  %s3241_s6 = inlined_call_operand.vmem [shape: f32[4,1,8], index: 6, kind: input, shape index: {}]   ;;  %s3242_s7 = inlined_call_operand.vmem [shape: bf16[4,8,32], index: 7, kind: input, shape index: {}]   ;;  %s3243_s8 = inlined_call_operand.vmem [shape: f32[1,32], index: 8, kind: input, shape index: {}]   ;;  %s3244_s9 = inlined_call_operand.vmem [shape: f32[1,32], index: 9, kind: input, shape index: {}]   ;;  %s3245_s10 = inlined_call_operand.vmem [shape: f32[1,32], index: 10, kind: input, shape index: {}]   ;;  %s3246_s11 = inlined_call_operand.vmem [shape: bf16[32,64], index: 11, kind: input, shape index: {}]   ;;  %s3247_s12 = inlined_call_operand.vmem [shape: f32[1,64], index: 12, kind: input, shape index: {}]   ;;  %s3248_s13 = inlined_call_operand.vmem [shape: bf16[64,32], index: 13, kind: input, shape index: {}]   ;;  %s3249_s14 = inlined_call_operand.vmem [shape: f32[1,32], index: 14, kind: input, shape index: {}]   ;;  %s3250_s15 = inlined_call_operand.vmem [shape: f32[1,32], index: 15, kind: input, shape index: {}]   ;;  %s3251_s16 = inlined_call_operand.vmem [shape: f32[1,32], index: 16, kind: input, shape index: {}]   ;;  %s3252_s17 = inlined_call_operand.hbm [shape: f32[2,8,32], index: 17, kind: output, shape index: {}]  }
   0x1   :  { %3259 = sst [smem:[#allocation10_spill]] %s3235_s0 }
   0x2   :  { %3260 = sst [smem:[#allocation11_spill]] %s3236_s1 }
   0x3   :  { %3261 = sst [smem:[#allocation12_spill]] %s3237_s2 }
   0x4   :  { %3262 = sst [smem:[#allocation13_spill]] %s3238_s3 }
   0x5   :  { %3263 = sst [smem:[#allocation14_spill]] %s3239_s4 }
   0x6   :  { %22 = vsyncpa [#allocation3], 0 }
   0x7   :  { %24 = vsyncpa [#allocation3 + $0x1], 0  ;;  %s2822_s24 = smov 0   ;;  %s2824_s25 = smov 0  }
   0x8   :  { %s2826_s26 = smov 0   ;;  %s2828_s27 = smov 0  }
   0x9 LB: > { %3264 = sst [smem:[#allocation5_spill]] %s2715_s24  ;;  %s2843_s28 = sadd.s32 4294967295, %s2727_s27   ;;  %s2727_s27 = sphi %s2828_s27, %s3278_s27   ;;  %s2723_s26 = sphi %s2826_s26, %s3280_s26   ;;  %s2719_s25 = sphi %s2824_s25, %s3282_s25   ;;  %s2715_s24 = sphi %s2822_s24, %s3281_s24  }
   0xa   : > { %3265 = sst [smem:[#allocation6_spill]] %s2723_s26  ;;  %s2235_s29 = sadd.s32 4294967294, %s2727_s27  }
   0xb   : > { %s2847_s0 = sadd.s32 1, %s2727_s27   ;;  %s399_s30 = sadd.s32 1, %s2723_s26 }
   0xc   : > { %3266 = sst [smem:[#allocation7_spill]] %s2847_s0  ;;  %s396_s18 = ssub.s32 %s2727_s27, %s2847_s0 }
   0xd   : > { %p409_p0 = scmp.ne.s32.totalorder %s2723_s26, %s2719_s25  ;;  %p397_p1 = scmp.eq.s32.totalorder %s396_s18, 0 }
   0xe   : > { %p410_p2 = scmp.eq.s32.totalorder %s2843_s28, 1  ;;  %p415_p3 = scmp.ne.s32.totalorder %s2719_s25, %s2715_s24 }
   0xf   : > { %p416_p4 = scmp.eq.s32.totalorder %s2235_s29, 1  ;;  %p2238_p7 = scmp.ge.s32.totalorder %s2727_s27, 1 }
  0x10   : > { %s2858_s19 = scalar_select %p397_p1, %s2723_s26, %s399_s30  }
  0x11   : > { %p2860_p5 = por %p410_p2, %p409_p0  ;;  %p2864_p6 = por %p416_p4, %p415_p3 }
  0x12   : > { %3267 = sst [smem:[#allocation8_spill]] %s2858_s19  ;;  %p489_p8 = scmp.lt.s32.totalorder %s2727_s27, 3 }
  0x13   : > { %s3269_s20 = scalar_select %p2864_p6, 1, 0 }
  0x14   : > { %p490_p9 = pnand %p2238_p7, %p489_p8 }
  0x15   : > { %3270 = sst [smem:[#allocation9_spill]] %s3269_s20  ;;  %p540_p10 = scmp.lt.s32.totalorder (!%p490_p9), %s2843_s28, 1 }
  0x16   : > { %493 = sbr.rel (%p490_p9) target bundleno = 2047 (0x7ff), region = 88  ;;  %s3271_s23 = sld [smem:[#allocation11_spill]] (!%p490_p9) }
  0x17   : > { %s3272_s20 = sld [smem:[#allocation10_spill]] (!%p490_p9)  ;;  %s537_s26 = sand.u32 (!%p490_p9), 1, %s2719_s25  }
  0x18   : > { %s3273_s2 = sld [smem:[#allocation12_spill]] (!%p490_p9)  ;;  %s2239_s0 = sshll.u32 (!%p490_p9), %s537_s26, 3 }
  0x19   : > { %s3274_s3 = sld [smem:[#allocation13_spill]] (!%p490_p9)  ;;  %s2317_s30 = sshll.u32 (!%p490_p9), %s2843_s28, 7 }
  0x1a   : > { %s3275_s4 = sld [smem:[#allocation14_spill]] (!%p490_p9)  ;;  %s539_s18 = scalar_lea.vmem (!%p490_p9), [#allocation2], %s2239_s0 }
  0x1b   : > { %v2729_v1 = vmov 0.0   ;;  %vm2730_vm0 = vmmov 0   ;;  %s541_s29 = scalar_select %p540_p10, %s2843_s28, 1  ;;  %vm603_vm1 = vcmask 261120   ;;  %v2257_v43 = vld [vmem:[%s3240_s5] ss:$0 sm:$0xff] }
  0x1c   : > { %v2617_v0 = vld [vmem:[%s3271_s23 + $0x8] sm:$0xff]   ;;  %2388 = vmatprep.subr.bf16.mxu0 %v2729_v1  ;;  %2396 = vmatprep.subr.bf16.mxu1 %v2729_v1  ;;  %v2618_v2 = vld [vmem:[%s3271_s23 + $0x18] sm:$0xff]   ;;  %v2619_v3 = vld [vmem:[%s3271_s23] sm:$0xff]   ;;  %vm1315_vm2 = vcmask 64512   ;;  %vm1551_vm3 = vcmask 1043456   ;;  %vm2087_vm4 = vcmask 523264  }
  0x1d   : > { %2389 = vmatpush3.bf16.msra.mxu0 %v2617_v0  ;;  %2392 = vmatprep.mubr.msk.bf16.mxu0 %vm2730_vm0, %v2729_v1  ;;  %v2620_v4 = vld [vmem:[%s3271_s23 + $0x10] sm:$0xff]   ;;  %s2240_s19 = sshll.u32 %s541_s29, 3  ;;  %v2621_v5 = vld [vmem:[%s3271_s23 + $0x28] sm:$0xff]   ;;  %v2622_v6 = vld [vmem:[%s3271_s23 + $0x38] sm:$0xff]   ;;  %s2176_s21 = sshll.u32 %s539_s18, 4  ;;  %s2177_s21 = int_to_ptr.vmem [resolvable:$true] %s2176_s21 }
  0x1e   : > { %2397 = vmatpush3.bf16.msra.mxu1 %v2618_v2  ;;  %2390 = vmatprep.subr.bf16.mxu0 %v2729_v1  ;;  %s543_s24 = scalar_lea.vmem %s3272_s20, %s2240_s19  ;;  %v2623_v9 = vld [vmem:[%s3271_s23 + $0x20] sm:$0xff]   ;;  %v2624_v10 = vld [vmem:[%s3271_s23 + $0x30] sm:$0xff]   ;;  %v2625_v11 = vld [vmem:[%s3273_s2 + $0x8] sm:$0xff]   ;;  %s2731_s20 = smov [#allocation2]  }
  0x1f   : > { %2398 = vmatprep.subr.bf16.mxu1 %v2729_v1  ;;  %2400 = vmatprep.mubr.msk.bf16.mxu1 %vm2730_vm0, %v2729_v1  ;;  %v2902_v7 = vld [vmem:[%s543_s24] sm:$0xff]  ;;  %v2626_v12 = vld [vmem:[%s3273_s2 + $0x18] sm:$0xff]   ;;  %v2628_v14 = vld [vmem:[%s3273_s2 + $0x10] sm:$0xff]   ;;  %s2667_s24 = scalar_lea.vmem %s2177_s21, 128  ;;  %s2671_s29 = sshll.u32 %s2731_s20, 4  ;;  %s2672_s29 = int_to_ptr.vmem [resolvable:$false] %s2671_s29 }
  0x20   : > { %v2907_v8 = vpack.c.bf16 %v2902_v7, %v2902_v7  ;;  %v2627_v13 = vld [vmem:[%s3273_s2] sm:$0xff]   ;;  %v2629_v15 = vld [vmem:[%s3273_s2 + $0x28] sm:$0xff]   ;;  %v2630_v16 = vld [vmem:[%s3273_s2 + $0x38] sm:$0xff]   ;;  %p2668_p11 = scmp.ne.s32.totalorder %s2177_s21, %s2667_s24  ;;  %s2673_s28 = scalar_lea.vmem %s2672_s29, 256 }
  0x21   : > { %2391 = vmatpush3.bf16.msra.mxu0 %v2619_v3  ;;  %v2631_v17 = vld [vmem:[%s3273_s2 + $0x20] sm:$0xff]   ;;  %v2632_v18 = vld [vmem:[%s3273_s2 + $0x30] sm:$0xff]   ;;  %v2633_v19 = vld [vmem:[%s3274_s3 + $0x8] sm:$0xff]   ;;  %p2674_p0 = scmp.lt.s32.totalorder %s2177_s21, %s2672_s29  ;;  %p2675_p1 = scmp.lt.s32.totalorder %s2673_s28, %s2667_s24 }
  0x22   : > { %2399 = vmatpush3.bf16.msra.mxu1 %v2620_v4  ;;  %2404 = vmatprep.subr.bf16.mxu0 %v2729_v1  ;;  %v2634_v20 = vld [vmem:[%s3274_s3] sm:$0xff]   ;;  %v2635_v21 = vld [vmem:[%s3274_s3 + $0x18] sm:$0xff]   ;;  %v2636_v22 = vld [vmem:[%s3274_s3 + $0x10] sm:$0xff]   ;;  %p2669_p12 = pnand %p2668_p11, %p2860_p5 }
  0x23   : > { %2412 = vmatprep.subr.bf16.mxu1 %v2729_v1  ;;  %v2637_v23 = vld [vmem:[%s3274_s3 + $0x28] sm:$0xff]   ;;  %v2638_v24 = vld [vmem:[%s3274_s3 + $0x20] sm:$0xff]   ;;  %v2639_v25 = vld [vmem:[%s3274_s3 + $0x38] sm:$0xff]   ;;  %p2676_p2 = por %p2675_p1, %p2674_p0 }
  0x24   : > { %2393 = vmatmul.mubr.msk.bf16.vlgmr.msra.gmra.mxu0 %vm603_vm1, %v2907_v8  ;;  %v2640_v26 = vld [vmem:[%s3274_s3 + $0x30] sm:$0xff]   ;;  %v2258_v44 = vld [vmem:[%s3240_s5 + $0x1] ss:$0 sm:$0xff]  ;;  %v2241_v53 = vld [vmem:[%s3275_s4] ss:$0 sm:$0xff]  ;;  %s2174_s3 = scalar_lea.hbm %s3252_s17, %s2317_s30  ;;  %p2670_p13 = pneg %p2669_p12 }
  0x25   : > { %2401 = vmatmul.mubr.msk.bf16.vlgmr.msra.gmra.mxu1 %vm603_vm1, %v2907_v8  ;;  %2405 = vmatpush3.bf16.msra.mxu0 %v2621_v5  ;;  %v2242_v54 = vld [vmem:[%s3275_s4 + $0x1] ss:$0 sm:$0xff]  ;;  %v2259_v61 = vld [vmem:[%s3240_s5 + $0x2] ss:$0 sm:$0xff]  ;;  %v2260_v62 = vld [vmem:[%s3240_s5 + $0x3] ss:$0 sm:$0xff] }
  0x26   : > { %2413 = vmatpush3.bf16.msra.mxu1 %v2622_v6  ;;  %2406 = vmatprep.subr.bf16.mxu0 %v2729_v1  ;;  %p2677_p3 = pnand %p2676_p2, %p2670_p13 }
  0x27   : > { %2414 = vmatprep.subr.bf16.mxu1 %v2729_v1  ;;  %2408 = vmatprep.mubr.msk.bf16.mxu0 %vm2730_vm0, %v2729_v1 }
  0x28   : > { %2416 = vmatprep.mubr.msk.bf16.mxu1 %vm2730_vm0, %v2729_v1 }
  0x29   : > { %2407 = vmatpush3.bf16.msra.mxu0 %v2623_v9 }
  0x2a   : > { %2415 = vmatpush3.bf16.msra.mxu1 %v2624_v10  ;;  %2420 = vmatprep.subr.bf16.mxu0 %v2729_v1 }
  0x2b   : > { %2428 = vmatprep.subr.bf16.mxu1 %v2729_v1 }
  0x2c   : > { %2409 = vmatmul.mubr.msk.bf16.vlgmr.msra.gmra.mxu0 %vm603_vm1, %v2907_v8 }
  0x2d   : > { %2417 = vmatmul.mubr.msk.bf16.vlgmr.msra.gmra.mxu1 %vm603_vm1, %v2907_v8  ;;  %2421 = vmatpush3.bf16.msra.mxu0 %v2625_v11 }
  0x2e   : > { %2429 = vmatpush3.bf16.msra.mxu1 %v2626_v12  ;;  %2422 = vmatprep.subr.bf16.mxu0 %v2729_v1 }
  0x2f   : > { %2430 = vmatprep.subr.bf16.mxu1 %v2729_v1  ;;  %2424 = vmatprep.mubr.msk.bf16.mxu0 %vm2730_vm0, %v2729_v1 }
  0x30   : > { %2432 = vmatprep.mubr.msk.bf16.mxu1 %vm2730_vm0, %v2729_v1 }
  0x31   : > { %2423 = vmatpush3.bf16.msra.mxu0 %v2627_v13  ;;  %v2243_v13 = vld [vmem:[%s3275_s4 + $0x2] ss:$0 sm:$0xff] }
  0x32   : > { %2431 = vmatpush3.bf16.msra.mxu1 %v2628_v14  ;;  %2436 = vmatprep.subr.bf16.mxu0 %v2729_v1  ;;  %v2244_v14 = vld [vmem:[%s3275_s4 + $0x3] ss:$0 sm:$0xff]  ;;  %s2163_s4 = scalar_lea.sflag [#allocation3], %s537_s26 }
  0x33   : > { %2444 = vmatprep.subr.bf16.mxu1 %v2729_v1 }
  0x34   : > { %2425 = vmatmul.mubr.msk.bf16.vlgmr.msra.gmra.mxu0 %vm603_vm1, %v2907_v8 }
  0x35   : > { %2433 = vmatmul.mubr.msk.bf16.vlgmr.msra.gmra.mxu1 %vm603_vm1, %v2907_v8  ;;  %2437 = vmatpush3.bf16.msra.mxu0 %v2629_v15 }
  0x36   : > { %2445 = vmatpush3.bf16.msra.mxu1 %v2630_v16  ;;  %2438 = vmatprep.subr.bf16.mxu0 %v2729_v1 }
  0x37   : > { %2446 = vmatprep.subr.bf16.mxu1 %v2729_v1  ;;  %2440 = vmatprep.mubr.msk.bf16.mxu0 %vm2730_vm0, %v2729_v1 }
  0x38   : > { %2448 = vmatprep.mubr.msk.bf16.mxu1 %vm2730_vm0, %v2729_v1 }
  0x39   : > { %2439 = vmatpush3.bf16.msra.mxu0 %v2631_v17 }
  0x3a   : > { %2447 = vmatpush3.bf16.msra.mxu1 %v2632_v18  ;;  %2452 = vmatprep.subr.bf16.mxu0 %v2729_v1 }
  0x3b   : > { %2460 = vmatprep.subr.bf16.mxu1 %v2729_v1 }
  0x3c   : > { %2441 = vmatmul.mubr.msk.bf16.vlgmr.msra.gmra.mxu0 %vm603_vm1, %v2907_v8 }
  0x3d   : > { %2449 = vmatmul.mubr.msk.bf16.vlgmr.msra.gmra.mxu1 %vm603_vm1, %v2907_v8  ;;  %2456 = vmatprep.mubr.msk.bf16.mxu0 %vm2730_vm0, %v2729_v1 }
  0x3e   : > { %2464 = vmatprep.mubr.msk.bf16.mxu1 %vm2730_vm0, %v2729_v1  ;;  %2453 = vmatpush3.bf16.msra.mxu0 %v2633_v19 }
  0x3f   : > { %2454 = vmatprep.subr.bf16.mxu0 %v2729_v1  ;;  %2461 = vmatpush3.bf16.msra.mxu1 %v2635_v21 }
  0x40   : > { %2462 = vmatprep.subr.bf16.mxu1 %v2729_v1 }
  0x42   : > { %2455 = vmatpush3.bf16.msra.mxu0 %v2634_v20 }
  0x43   : > { %2468 = vmatprep.subr.bf16.mxu0 %v2729_v1  ;;  %2463 = vmatpush3.bf16.msra.mxu1 %v2636_v22 }
  0x44   : > { %2476 = vmatprep.subr.bf16.mxu1 %v2729_v1 }
  0x45   : > { %2457 = vmatmul.mubr.msk.bf16.vlgmr.msra.gmra.mxu0 %vm603_vm1, %v2907_v8 }
  0x46   : > { %2469 = vmatpush3.bf16.msra.mxu0 %v2637_v23  ;;  %2472 = vmatprep.mubr.msk.bf16.mxu0 %vm2730_vm0, %v2729_v1 }
  0x47   : > { %2470 = vmatprep.subr.bf16.mxu0 %v2729_v1  ;;  %2465 = vmatmul.mubr.msk.bf16.vlgmr.msra.gmra.mxu1 %vm603_vm1, %v2907_v8 }
  0x48   : > { %2477 = vmatpush3.bf16.msra.mxu1 %v2639_v25  ;;  %2480 = vmatprep.mubr.msk.bf16.mxu1 %vm2730_vm0, %v2729_v1  ;;  %v2273_v25 = vld [vmem:[%s3241_s6] ss:$0 sm:$0xff] }
  0x49   : > { %2478 = vmatprep.subr.bf16.mxu1 %v2729_v1 }
  0x4a   : > { %2471 = vmatpush3.bf16.msra.mxu0 %v2638_v24 }
  0x4b   : > { %2484 = vmatprep.subr.bf16.mxu0 %v2729_v1 }
  0x4c   : > { %2479 = vmatpush3.bf16.msra.mxu1 %v2640_v26 }
  0x4d   : > { %2473 = vmatmul.mubr.msk.bf16.vlgmr.msra.gmra.mxu0 %vm603_vm1, %v2907_v8  ;;  %2490 = vmatprep.subr.bf16.mxu1 %v2729_v1 }
  0x4e   : > { %2486 = vmatprep.mubr.msk.bf16.mxu0 %vm2730_vm0, %v2729_v1 }
  0x4f   : > { %2481 = vmatmul.mubr.msk.bf16.vlgmr.msra.gmra.mxu1 %vm603_vm1, %v2907_v8 }
  0x50   : > { %2492 = vmatprep.mubr.msk.bf16.mxu1 %vm2730_vm0, %v2729_v1 }
  0xe4   : > { %v641_v27 = vpop.f32.mrf.mxu0 }
  0xe5   : > { %v693_v28 = vpop.f32.mrf.mxu1  ;;  %v642_v63 = vadd.f32 %v2241_v53, %v641_v27 }
  0xe6   : > { %v2394_v29 = vpop.f32.mrf.mxu0  ;;  %v694_v0 = vadd.f32 %v2242_v54, %v693_v28 }
  0xe7   : > { %v2402_v30 = vpop.f32.mrf.mxu1  ;;  %v1307_v9 = vpack.c.bf16 %v642_v63, %v642_v63  ;;  %v2274_v29 = vld [vmem:[%s3241_s6 + $0x1] ss:$0 sm:$0xff] }
  0xe8   : > { %v644_v31 = vpop.f32.mrf.mxu0  ;;  %v1308_v10 = vpack.c.bf16 %v694_v0, %v694_v0 }
  0xe9   : > { %v696_v32 = vpop.f32.mrf.mxu1 }
  0xea   : > { %v2395_v33 = vpop.f32.mrf.mxu0 }
  0xeb   : > { %v2403_v34 = vpop.f32.mrf.mxu1 }
  0xec   : > { %v745_v35 = vpop.f32.mrf.mxu0 }
  0xed   : > { %v797_v36 = vpop.f32.mrf.mxu1  ;;  %v746_v21 = vadd.f32 %v2243_v13, %v745_v35 }
  0xee   : > { %v2410_v37 = vpop.f32.mrf.mxu0  ;;  %v798_v22 = vadd.f32 %v2244_v14, %v797_v36 }
  0xef   : > { %v2418_v38 = vpop.f32.mrf.mxu1  ;;  %v1309_v23 = vpack.c.bf16 %v746_v21, %v746_v21 }
  0xf0   : > { %v748_v39 = vpop.f32.mrf.mxu0  ;;  %v1310_v24 = vpack.c.bf16 %v798_v22, %v798_v22 }
  0xf1   : > { %v800_v40 = vpop.f32.mrf.mxu1 }
  0xf2   : > { %v2411_v41 = vpop.f32.mrf.mxu0 }
  0xf3   : > { %v2419_v42 = vpop.f32.mrf.mxu1 }
  0xf4   : > { %v893_v45 = vpop.f32.mrf.mxu0 }
  0xf5   : > { %v945_v46 = vpop.f32.mrf.mxu1  ;;  %v894_v47 = vadd.f32 %v2257_v43, %v893_v45 }
  0xf6   : > { %v946_v48 = vadd.f32 %v2258_v44, %v945_v46  ;;  %v2426_v49 = vpop.f32.mrf.mxu0 }
  0xf7   : > { %v2434_v50 = vpop.f32.mrf.mxu1  ;;  %v1311_v51 = vpack.c.bf16 %v894_v47, %v894_v47 }
  0xf8   : > { %v1312_v52 = vpack.c.bf16 %v946_v48, %v946_v48  ;;  %v896_v55 = vpop.f32.mrf.mxu0 }
  0xf9   : > { %v948_v56 = vpop.f32.mrf.mxu1  ;;  %v1320_v57 = vsel %vm1315_vm2, %v1311_v51, 0 }
  0xfa   : > { %v1366_v58 = vsel %vm1315_vm2, %v1312_v52, 0  ;;  %v2427_v59 = vpop.f32.mrf.mxu0  ;;  %2485 = vmatpush3.bf16.xpose.msra.mxu0 %v1320_v57 }
  0xfb   : > { %v2435_v60 = vpop.f32.mrf.mxu1  ;;  %2491 = vmatpush3.bf16.xpose.msra.mxu1 %v1366_v58  ;;  %2496 = vmatprep.subr.bf16.mxu0 %v2729_v1 }
  0xfc   : > { %2502 = vmatprep.subr.bf16.mxu1 %v2729_v1  ;;  %v997_v2 = vpop.f32.mrf.mxu0 }
  0xfd   : > { %v1049_v3 = vpop.f32.mrf.mxu1  ;;  %v998_v4 = vadd.f32 %v2259_v61, %v997_v2 }
  0xfe   : > { %v1050_v5 = vadd.f32 %v2260_v62, %v1049_v3  ;;  %v2442_v6 = vpop.f32.mrf.mxu0 }
  0xff   : > { %v2450_v8 = vpop.f32.mrf.mxu1  ;;  %v1313_v11 = vpack.c.bf16 %v998_v4, %v998_v4 }
 0x100   : > { %v1314_v12 = vpack.c.bf16 %v1050_v5, %v1050_v5  ;;  %v1000_v15 = vpop.f32.mrf.mxu0 }
 0x101   : > { %v1052_v16 = vpop.f32.mrf.mxu1  ;;  %v1412_v17 = vsel %vm1315_vm2, %v1313_v11, 0  ;;  %2487 = vmatmul.mubr.msk.bf16.vlgmr.msra.gmra.mxu0 %vm1315_vm2, %v1307_v9 }
 0x102   : > { %v1458_v18 = vsel %vm1315_vm2, %v1314_v12, 0  ;;  %2493 = vmatmul.mubr.msk.bf16.vlgmr.msra.gmra.mxu1 %vm1315_vm2, %v1308_v10  ;;  %v2443_v19 = vpop.f32.mrf.mxu0  ;;  %2497 = vmatpush3.bf16.xpose.msra.mxu0 %v1412_v17 }
 0x103   : > { %v2451_v20 = vpop.f32.mrf.mxu1  ;;  %2503 = vmatpush3.bf16.xpose.msra.mxu1 %v1458_v18  ;;  %2498 = vmatprep.mubr.msk.bf16.mxu0 %vm2730_vm0, %v2729_v1  ;;  %v2275_v19 = vld [vmem:[%s3241_s6 + $0x2] ss:$0 sm:$0xff] }
 0x104   : > { %2504 = vmatprep.mubr.msk.bf16.mxu1 %vm2730_vm0, %v2729_v1  ;;  %2508 = vmatprep.subr.bf16.mxu0 %v2729_v1 }
 0x105   : > { %2514 = vmatprep.subr.bf16.mxu1 %v2729_v1  ;;  %v1145_v26 = vpop.f32.mrf.mxu0 }
 0x106   : > { %v1146_v27 = vadd.f32 %v2273_v25, %v1145_v26 }
 0x107   : > { %v2458_v28 = vpop.f32.mrf.mxu0  ;;  %v1197_v32 = vpop.f32.mrf.mxu1 }
 0x108   : > { %v1544_v30 = vpack.c.bf16 %v1146_v27, %v1146_v27  ;;  %v1198_v34 = vadd.f32 %v2274_v29, %v1197_v32 }
 0x109   : > { %2499 = vmatmul.mubr.msk.bf16.vlgmr.msra.gmra.mxu0 %vm1315_vm2, %v1309_v23  ;;  %v1148_v31 = vpop.f32.mrf.mxu0  ;;  %v2466_v36 = vpop.f32.mrf.mxu1 }
 0x10a   : > { %2505 = vmatmul.mubr.msk.bf16.vlgmr.msra.gmra.mxu1 %vm1315_vm2, %v1310_v24  ;;  %2510 = vmatprep.mubr.msk.bf16.mxu0 %vm2730_vm0, %v2729_v1  ;;  %v1553_v33 = vsel %vm1551_vm3, %v1544_v30, 0  ;;  %v1545_v37 = vpack.c.bf16 %v1198_v34, %v1198_v34  ;;  %v2276_v24 = vld [vmem:[%s3241_s6 + $0x3] ss:$0 sm:$0xff] }
 0x10b   : > { %2516 = vmatprep.mubr.msk.bf16.mxu1 %vm2730_vm0, %v2729_v1  ;;  %v2459_v35 = vpop.f32.mrf.mxu0  ;;  %2509 = vmatpush3.bf16.msra.mxu0 %v1553_v33  ;;  %v1200_v38 = vpop.f32.mrf.mxu1 }
 0x10c   : > { %2520 = vmatprep.subr.bf16.mxu0 %v2729_v1  ;;  %v1599_v40 = vsel %vm1551_vm3, %v1545_v37, 0 }
 0x10d   : > { %v1249_v39 = vpop.f32.mrf.mxu0  ;;  %v2467_v41 = vpop.f32.mrf.mxu1  ;;  %2515 = vmatpush3.bf16.msra.mxu1 %v1599_v40 }
 0x10e   : > { %2526 = vmatprep.subr.bf16.mxu1 %v2729_v1  ;;  %v1250_v22 = vadd.f32 %v2275_v19, %v1249_v39 }
 0x10f   : > { %v2474_v42 = vpop.f32.mrf.mxu0  ;;  %v1301_v44 = vpop.f32.mrf.mxu1 }
 0x110   : > { %v1546_v26 = vpack.c.bf16 %v1250_v22, %v1250_v22  ;;  %v1302_v27 = vadd.f32 %v2276_v24, %v1301_v44 }
 0x111   : > { %v1252_v43 = vpop.f32.mrf.mxu0  ;;  %v2482_v46 = vpop.f32.mrf.mxu1 }
 0x112   : > { %v1645_v31 = vsel %vm1551_vm3, %v1546_v26, 0  ;;  %v1547_v32 = vpack.c.bf16 %v1302_v27, %v1302_v27  ;;  %v1745_v43 = vld [vmem:[%s3242_s7] sm:$0xf] }
 0x113   : > { %v2475_v45 = vpop.f32.mrf.mxu0  ;;  %v1304_v47 = vpop.f32.mrf.mxu1  ;;  %v1753_v44 = vsel %vm1551_vm3, %v1745_v43, 0 }
 0x114   : > { %v1691_v36 = vsel %vm1551_vm3, %v1547_v32, 0  ;;  %v1746_v45 = vld [vmem:[%s3242_s7 + $0x4] sm:$0xf] }
 0x115   : > { %v2483_v48 = vpop.f32.mrf.mxu1  ;;  %v1799_v46 = vsel %vm1551_vm3, %v1746_v45, 0 }
 0x1c1   : > { %v1356_v49 = vpop.f32.mrf.mxu0 }
 0x1c2   : > { %v1402_v50 = vpop.f32.mrf.mxu1  ;;  %v1500_v51 = vmul.f32 0.35355338, %v1356_v49 }
 0x1c3   : > { %v2488_v52 = vpop.f32.mrf.mxu0  ;;  %v1501_v54 = vmul.f32 0.35355338, %v1402_v50 }
 0x1c4   : > { %v2494_v53 = vpop.f32.mrf.mxu1  ;;  %v1504_v55 = vsel %vm1315_vm2, %v1500_v51, -inf }
 0x1c5   : > { %1505 = vmax.xlane.f32.xlu0 %v1504_v55  ;;  %v1359_v57 = vpop.f32.mrf.mxu0  ;;  %v1507_v60 = vsel %vm1315_vm2, %v1501_v54, -inf  ;;  %v1747_v53 = vld [vmem:[%s3242_s7 + $0x8] sm:$0xf] }
 0x1c6   : > { %v1405_v56 = vpop.f32.mrf.mxu1  ;;  %v1845_v57 = vsel %vm1551_vm3, %v1747_v53, 0  ;;  %v2641_v53 = vld [vmem:[%s3246_s11 + $0x8] sm:$0xff]  }
 0x1c7   : > { %v2489_v58 = vpop.f32.mrf.mxu0 }
 0x1c8   : > { %v2495_v59 = vpop.f32.mrf.mxu1 }
 0x1c9   : > { %1508 = vmax.xlane.f32.xlu0 %v1507_v60  ;;  %v1448_v62 = vpop.f32.mrf.mxu0 }
 0x1ca   : > { %v1494_v61 = vpop.f32.mrf.mxu1  ;;  %v1502_v63 = vmul.f32 0.35355338, %v1448_v62 }
 0x1cb   : > { %v2500_v0 = vpop.f32.mrf.mxu0  ;;  %v1503_v3 = vmul.f32 0.35355338, %v1494_v61  ;;  %v1748_v61 = vld [vmem:[%s3242_s7 + $0xc] sm:$0xf] }
 0x1cc   : > { %v2506_v2 = vpop.f32.mrf.mxu1  ;;  %v1510_v4 = vsel %vm1315_vm2, %v1502_v63, -inf }
 0x1cd   : > { %1511 = vmax.xlane.f32.xlu1 %v1510_v4  ;;  %v1451_v6 = vpop.f32.mrf.mxu0  ;;  %v1513_v10 = vsel %vm1315_vm2, %v1503_v3, -inf }
 0x1ce   : > { %v1497_v5 = vpop.f32.mrf.mxu1 }
 0x1cf   : > { %v2501_v8 = vpop.f32.mrf.mxu0 }
 0x1d0   : > { %v2507_v9 = vpop.f32.mrf.mxu1 }
 0x1d1   : > { %1514 = vmax.xlane.f32.xlu1 %v1513_v10 }
 0x24e   : > { %v1506_v11 = vpop.xlane.xlu0 %1505 }
 0x24f   : > { %v1516_v12 = vsub.f32 %v1500_v51, %v1506_v11 }
 0x251   : > { %v1520_v13 = vmul.f32 1.442695, %v1516_v12 }
 0x252   : > { %v1509_v14 = vpop.xlane.xlu0 %1508 }
 0x253   : > { %2647 = vpow2.f32 %v1520_v13  ;;  %v1517_v15 = vsub.f32 %v1501_v54, %v1509_v14 }
 0x255   : > { %v1522_v16 = vmul.f32 1.442695, %v1517_v15 }
 0x256   : > { %v1512_v17 = vpop.xlane.xlu1 %1511 }
 0x257   : > { %2649 = vpow2.f32 %v1522_v16  ;;  %v1518_v18 = vsub.f32 %v1502_v63, %v1512_v17 }
 0x259   : > { %v1524_v20 = vmul.f32 1.442695, %v1518_v18 }
 0x25a   : > { %v1515_v21 = vpop.xlane.xlu1 %1514 }
 0x25b   : > { %2651 = vpow2.f32 %v1524_v20  ;;  %v1519_v23 = vsub.f32 %v1503_v3, %v1515_v21  ;;  %v1891_v3 = vsel %vm1551_vm3, %v1748_v61, 0 }
 0x25d   : > { %v1526_v25 = vmul.f32 1.442695, %v1519_v23 }
 0x25f   : > { %2653 = vpow2.f32 %v1526_v25 }
 0x260   : > { %v2648_v28 = vpop.eup %2647 }
 0x261   : > { %v1528_v29 = vsel %vm1315_vm2, %v2648_v28, 0.0  ;;  %v1540_v30 = vpack.c.bf16 %v2648_v28, %v2648_v28 }
 0x262   : > { %1529 = vadd.xlane.f32.xlu0 %v1528_v29 }
 0x263   : > { %2511 = vmatmul.mubr.msk.bf16.vlgmr.msra.gmra.mxu0 %vm1315_vm2, %v1540_v30 }
 0x264   : > { %v2650_v33 = vpop.eup %2649  ;;  %2521 = vmatpush3.bf16.msra.mxu0 %v1645_v31  ;;  %2522 = vmatprep.mubr.msk.bf16.mxu0 %vm2730_vm0, %v2729_v1 }
 0x265   : > { %v1531_v34 = vsel %vm1315_vm2, %v2650_v33, 0.0  ;;  %v1541_v35 = vpack.c.bf16 %v2650_v33, %v2650_v33  ;;  %2532 = vmatprep.subr.bf16.mxu0 %v2729_v1 }
 0x266   : > { %1532 = vadd.xlane.f32.xlu1 %v1531_v34 }
 0x267   : > { %2517 = vmatmul.mubr.msk.bf16.vlgmr.msra.gmra.mxu1 %vm1315_vm2, %v1541_v35 }
 0x268   : > { %v2652_v37 = vpop.eup %2651  ;;  %2527 = vmatpush3.bf16.msra.mxu1 %v1691_v36  ;;  %2528 = vmatprep.mubr.msk.bf16.mxu1 %vm2730_vm0, %v2729_v1 }
 0x269   : > { %v1534_v38 = vsel %vm1315_vm2, %v2652_v37, 0.0  ;;  %v1542_v39 = vpack.c.bf16 %v2652_v37, %v2652_v37  ;;  %2538 = vmatprep.subr.bf16.mxu1 %v2729_v1 }
 0x26a   : > { %1535 = vadd.xlane.f32.xlu0 %v1534_v38 }
 0x26b   : > { %2523 = vmatmul.mubr.msk.bf16.vlgmr.msra.gmra.mxu0 %vm1315_vm2, %v1542_v39  ;;  %v2301_v39 = vld [vmem:[%s3243_s8] ss:$0 sm:$0xff] }
 0x26c   : > { %v2654_v40 = vpop.eup %2653  ;;  %2534 = vmatprep.mubr.msk.bf16.mxu0 %vm2730_vm0, %v2729_v1  ;;  %2533 = vmatpush3.bf16.msra.mxu0 %v1753_v44 }
 0x26d   : > { %v1537_v41 = vsel %vm1315_vm2, %v2654_v40, 0.0  ;;  %v1543_v42 = vpack.c.bf16 %v2654_v40, %v2654_v40  ;;  %2544 = vmatprep.subr.bf16.mxu0 %v2729_v1 }
 0x26e   : > { %1538 = vadd.xlane.f32.xlu1 %v1537_v41 }
 0x26f   : > { %2529 = vmatmul.mubr.msk.bf16.vlgmr.msra.gmra.mxu1 %vm1315_vm2, %v1543_v42 }
 0x270   : > { %2540 = vmatprep.mubr.msk.bf16.mxu1 %vm2730_vm0, %v2729_v1  ;;  %2539 = vmatpush3.bf16.msra.mxu1 %v1799_v46 }
 0x271   : > { %2550 = vmatprep.subr.bf16.mxu1 %v2729_v1 }
 0x2eb   : > { %v1530_v47 = vpop.xlane.xlu0 %1529 }
 0x2ec   : > { %2655 = vrcp.f32 %v1530_v47 }
 0x2ef   : > { %v1533_v48 = vpop.xlane.xlu1 %1532 }
 0x2f0   : > { %2657 = vrcp.f32 %v1533_v48 }
 0x2f3   : > { %v1536_v49 = vpop.xlane.xlu0 %1535 }
 0x2f4   : > { %2659 = vrcp.f32 %v1536_v49 }
 0x2f7   : > { %v1539_v50 = vpop.xlane.xlu1 %1538 }
 0x2f8   : > { %2661 = vrcp.f32 %v1539_v50 }
 0x2f9   : > { %v2656_v51 = vpop.eup %2655 }
 0x2fd   : > { %v2658_v58 = vpop.eup %2657 }
 0x301   : > { %v2660_v4 = vpop.eup %2659 }
 0x305   : > { %v2662_v12 = vpop.eup %2661 }
 0x323   : > { %v1589_v52 = vpop.f32.mrf.mxu0 }
 0x324   : > { %v1737_v54 = vmul.f32 %v2656_v51, %v1589_v52 }
 0x325   : > { %v2512_v55 = vpop.f32.mrf.mxu0 }
 0x326   : > { %v1741_v56 = vpack.c.bf16 %v1737_v54, %v1737_v54  ;;  %v2642_v54 = vld [vmem:[%s3246_s11] sm:$0xff]   ;;  %v2644_v55 = vld [vmem:[%s3248_s13 + $0x10] sm:$0xff]  }
 0x327   : > { %v1592_v59 = vpop.f32.mrf.mxu0  ;;  %v1635_v60 = vpop.f32.mrf.mxu1 }
 0x328   : > { %v1738_v62 = vmul.f32 %v2658_v58, %v1635_v60  ;;  %2535 = vmatmul.mubr.msk.bf16.vlgmr.msra.gmra.mxu0 %vm1315_vm2, %v1741_v56  ;;  %v2302_v60 = vld [vmem:[%s3244_s9] ss:$0 sm:$0xff] }
 0x329   : > { %v2513_v63 = vpop.f32.mrf.mxu0  ;;  %v2518_v0 = vpop.f32.mrf.mxu1  ;;  %2545 = vmatpush3.bf16.msra.mxu0 %v1845_v57  ;;  %2546 = vmatprep.mubr.msk.bf16.mxu0 %vm2730_vm0, %v2729_v1 }
 0x32a   : > { %v1742_v2 = vpack.c.bf16 %v1738_v62, %v1738_v62  ;;  %2556 = vmatprep.subr.bf16.mxu0 %v2729_v1  ;;  %v2303_v62 = vld [vmem:[%s3245_s10] ss:$0 sm:$0xff] }
 0x32b   : > { %v1638_v5 = vpop.f32.mrf.mxu1  ;;  %v1681_v6 = vpop.f32.mrf.mxu0 }
 0x32c   : > { %v1739_v8 = vmul.f32 %v2660_v4, %v1681_v6  ;;  %2541 = vmatmul.mubr.msk.bf16.vlgmr.msra.gmra.mxu1 %vm1315_vm2, %v1742_v2  ;;  %v2646_v4 = vld [vmem:[%s3248_s13] sm:$0xff]  }
 0x32d   : > { %v2519_v9 = vpop.f32.mrf.mxu1  ;;  %v2524_v10 = vpop.f32.mrf.mxu0  ;;  %2551 = vmatpush3.bf16.msra.mxu1 %v1891_v3  ;;  %2552 = vmatprep.mubr.msk.bf16.mxu1 %vm2730_vm0, %v2729_v1  ;;  %v2645_v3 = vld [vmem:[%s3248_s13 + $0x8] sm:$0xff]   ;;  %v2304_v5 = vld [vmem:[%s3247_s12] ss:$0 sm:$0xff] }
 0x32e   : > { %v1743_v11 = vpack.c.bf16 %v1739_v8, %v1739_v8  ;;  %2564 = vmatprep.subr.bf16.mxu1 %v2729_v1 }
 0x32f   : > { %v1684_v13 = vpop.f32.mrf.mxu0  ;;  %v1727_v14 = vpop.f32.mrf.mxu1 }
 0x330   : > { %v1740_v15 = vmul.f32 %v2662_v12, %v1727_v14  ;;  %2547 = vmatmul.mubr.msk.bf16.vlgmr.msra.gmra.mxu0 %vm1315_vm2, %v1743_v11 }
 0x331   : > { %v2525_v16 = vpop.f32.mrf.mxu0  ;;  %v2530_v17 = vpop.f32.mrf.mxu1  ;;  %2560 = vmatprep.mubr.msk.bf16.mxu0 %vm2730_vm0, %v2729_v1  ;;  %2557 = vmatpush3.bf16.msra.mxu0 %v2641_v53 }
 0x332   : > { %v1744_v18 = vpack.c.bf16 %v1740_v15, %v1740_v15  ;;  %2558 = vmatprep.subr.bf16.mxu0 %v2729_v1 }
 0x333   : > { %v1730_v19 = vpop.f32.mrf.mxu1 }
 0x334   : > { %2553 = vmatmul.mubr.msk.bf16.vlgmr.msra.gmra.mxu1 %vm1315_vm2, %v1744_v18 }
 0x335   : > { %v2531_v20 = vpop.f32.mrf.mxu1  ;;  %2572 = vmatprep.mubr.msk.bf16.mxu1 %vm2730_vm0, %v2729_v1  ;;  %2559 = vmatpush3.bf16.msra.mxu0 %v2642_v54 }
 0x3e8   : > { %v1789_v21 = vpop.f32.mrf.mxu0 }
 0x3e9   : > { %v1933_v30 = vsel %vm603_vm1, %v1789_v21, 0.0 }
 0x3ea   : > { %v2536_v22 = vpop.f32.mrf.mxu0 }
 0x3ec   : > { %v1792_v23 = vpop.f32.mrf.mxu0  ;;  %v1835_v24 = vpop.f32.mrf.mxu1 }
 0x3ed   : > { %v1934_v27 = vsel %vm603_vm1, %v1835_v24, 0.0 }
 0x3ee   : > { %v2537_v25 = vpop.f32.mrf.mxu0  ;;  %v2542_v26 = vpop.f32.mrf.mxu1  ;;  %v1935_v32 = vadd.f32 %v1934_v27, %v1933_v30  ;;  %v2314_v30 = vld [vmem:[%s3250_s15] ss:$0 sm:$0xff] }
 0x3f0   : > { %v1838_v28 = vpop.f32.mrf.mxu1  ;;  %v1881_v29 = vpop.f32.mrf.mxu0 }
 0x3f1   : > { %v1936_v31 = vsel %vm603_vm1, %v1881_v29, 0.0 }
 0x3f2   : > { %v2543_v33 = vpop.f32.mrf.mxu1  ;;  %v2548_v34 = vpop.f32.mrf.mxu0  ;;  %v1937_v35 = vadd.f32 %v1936_v31, %v1935_v32  ;;  %v2315_v32 = vld [vmem:[%s3251_s16] ss:$0 sm:$0xff] }
 0x3f4   : > { %v1884_v36 = vpop.f32.mrf.mxu0  ;;  %v1927_v37 = vpop.f32.mrf.mxu1 }
 0x3f5   : > { %v1938_v38 = vsel %vm603_vm1, %v1927_v37, 0.0 }
 0x3f6   : > { %v1939_v40 = vadd.f32 %v1938_v38, %v1937_v35  ;;  %v2549_v41 = vpop.f32.mrf.mxu0  ;;  %v2554_v42 = vpop.f32.mrf.mxu1 }
 0x3f8   : > { %v1947_v43 = vadd.f32 %v2301_v39, %v1939_v40  ;;  %v1930_v44 = vpop.f32.mrf.mxu1 }
 0x3fa   : > { %v2555_v45 = vpop.f32.mrf.mxu1  ;;  %v1948_v46 = vadd.f32 %v1947_v43, %v2902_v7  ;;  %v2643_v7 = vld [vmem:[%s3248_s13 + $0x18] sm:$0xff]  }
 0x3fb   : > { %2565 = vmatpush3.bf16.msra.mxu1 %v2643_v7 }
 0x3fc   : > { %v1951_v47 = vsel %vm603_vm1, %v1948_v46, 0.0  ;;  %2566 = vmatprep.subr.bf16.mxu1 %v2729_v1 }
 0x3fd   : > { %1952 = vadd.xlane.f32.xlu0 %v1951_v47 }
 0x3ff   : > { %2567 = vmatpush3.bf16.msra.mxu1 %v2644_v55 }
 0x400   : > { %2568 = vmatprep.subr.bf16.mxu1 %v2729_v1 }
 0x403   : > { %2569 = vmatpush3.bf16.msra.mxu1 %v2645_v3 }
 0x404   : > { %2570 = vmatprep.subr.bf16.mxu1 %v2729_v1  ;;  %v2308_v1 = vld [vmem:[%s3249_s14] ss:$0 sm:$0xff] }
 0x407   : > { %2571 = vmatpush3.bf16.msra.mxu1 %v2646_v4 }
 0x486   : > { %v1953_v48 = vpop.xlane.xlu0 %1952 }
 0x487   : > { %v1955_v49 = vmul.f32 0.03125, %v1953_v48 }
 0x489   : > { %v1956_v50 = vsub.f32 %v1948_v46, %v1955_v49 }
 0x48b   : > { %v1957_v51 = vmul.f32 %v1956_v50, %v1956_v50 }
 0x48d   : > { %v1958_v52 = vsel %vm603_vm1, %v1957_v51, 0.0 }
 0x48e   : > { %1959 = vadd.xlane.f32.xlu1 %v1958_v52 }
 0x517   : > { %v1960_v56 = vpop.xlane.xlu1 %1959 }
 0x518   : > { %v1961_v57 = vmul.f32 0.03125, %v1960_v56 }
 0x51a   : > { %v1962_v58 = vadd.f32 1e-05, %v1961_v57 }
 0x51c   : > { %2663 = vrsqrt.f32 %v1962_v58 }
 0x529   : > { %v2664_v59 = vpop.eup %2663 }
 0x52a   : > { %v1964_v61 = vmul.f32 %v2664_v59, %v1956_v50 }
 0x52c   : > { %v1971_v63 = vmul.f32 %v2302_v60, %v1964_v61 }
 0x52e   : > { %v1978_v0 = vadd.f32 %v2303_v62, %v1971_v63 }
 0x530   : > { %v1979_v2 = vpack.c.bf16 %v1978_v0, %v1978_v0 }
 0x532   : > { %2561 = vmatmul.mubr.msk.bf16.vlgmr.msra.gmra.mxu0 %vm603_vm1, %v1979_v2 }
 0x5f2   : > { %v2040_v6 = vpop.f32.mrf.mxu0 }
 0x5f3   : > { %v2041_v8 = vadd.f32 %v2304_v5, %v2040_v6 }
 0x5f4   : > { %v2562_v9 = vpop.f32.mrf.mxu0 }
 0x5f5   : > { %v2046_v10 = vmax.f32 %v2041_v8, 0.0 }
 0x5f6   : > { %v2043_v11 = vpop.f32.mrf.mxu0 }
 0x5f7   : > { %v2047_v12 = vpack.c.bf16 %v2046_v10, %v2046_v10 }
 0x5f8   : > { %v2563_v13 = vpop.f32.mrf.mxu0 }
 0x5f9   : > { %2573 = vmatmul.mubr.msk.bf16.vlgmr.msra.gmra.mxu1 %vm2087_vm4, %v2047_v12 }
 0x6b9   : > { %v2125_v14 = vpop.f32.mrf.mxu1 }
 0x6ba   : > { %v2126_v15 = vadd.f32 %v2308_v1, %v2125_v14 }
 0x6bb   : > { %v2574_v16 = vpop.f32.mrf.mxu1 }
 0x6bc   : > { %v2131_v17 = vadd.f32 %v2126_v15, %v1978_v0 }
 0x6bd   : > { %v2128_v18 = vpop.f32.mrf.mxu1 }
 0x6be   : > { %v2134_v19 = vsel %vm603_vm1, %v2131_v17, 0.0 }
 0x6bf   : > { %2135 = vadd.xlane.f32.xlu0 %v2134_v19  ;;  %v2575_v20 = vpop.f32.mrf.mxu1 }
 0x748   : > { %v2136_v21 = vpop.xlane.xlu0 %2135 }
 0x749   : > { %v2137_v22 = vmul.f32 0.03125, %v2136_v21 }
 0x74b   : > { %v2138_v23 = vsub.f32 %v2131_v17, %v2137_v22 }
 0x74d   : > { %v2139_v24 = vmul.f32 %v2138_v23, %v2138_v23 }
 0x74f   : > { %v2140_v25 = vsel %vm603_vm1, %v2139_v24, 0.0 }
 0x750   : > { %2141 = vadd.xlane.f32.xlu1 %v2140_v25 }
 0x7d9   : > { %v2142_v26 = vpop.xlane.xlu1 %2141 }
 0x7da   : > { %v2143_v27 = vmul.f32 0.03125, %v2142_v26 }
 0x7dc   : > { %v2144_v28 = vadd.f32 1e-05, %v2143_v27 }
 0x7de   : > { %2665 = vrsqrt.f32 %v2144_v28 }
 0x7eb   : > { %v2666_v29 = vpop.eup %2665 }
 0x7ec   : > { %v2146_v31 = vmul.f32 %v2666_v29, %v2138_v23 }
 0x7ee   : > { %v2153_v33 = vmul.f32 %v2314_v30, %v2146_v31 }
 0x7f0   : > { %v2160_v34 = vadd.f32 %v2315_v32, %v2153_v33 }
 0x7f2   : > { %2161 = vst.msk [vmem:[%s539_s18] sm:$0xff] %vm603_vm1, %v2160_v34 }
 0x7f3   : > { %2680 = shalt.err (!%p2677_p3)
}
 0x7f4   : > { %s2681_s2 = scalar_lea.hbm %s2174_s3, 128  ;;  %s2685_s19 = scalar_lea.hbm %s3252_s17, 256 }
 0x7f5   : > { %p2682_p4 = scmp.ne.s32.totalorder %s2174_s3, %s2681_s2  ;;  %p2686_p9 = scmp.lt.s32.totalorder %s2174_s3, %s3252_s17 }
 0x7f6   : > { %p2687_p10 = scmp.lt.s32.totalorder %s2685_s19, %s2681_s2 }
 0x7f7   : > { %p2683_p7 = pnand %p2682_p4, %p2860_p5 }
 0x7f8   : > { %p2688_p11 = por %p2687_p10, %p2686_p9 }
 0x7f9   : > { %p2684_p8 = pneg %p2683_p7 }
 0x7fb   : > { %p2689_p12 = pnand %p2688_p11, %p2684_p8 }
 0x7fd   : > { %2692 = shalt.err (!%p2689_p12)
}
 0x7fe   : > { %2576 = dma.vmem_to_hbm [thread:$0]  (%p2860_p5), %s2177_s21, 128, %s2174_s3, %s2163_s4  }
 0x7ff PF: > { %s3276_s22 = sld [smem:[#allocation5_spill]]  ;;  %p2582_p13 = scmp.ge.s32.totalorder %s2727_s27, 2 }
 0x801   : > { %p2579_p0 = pnand %p2582_p13, %p2864_p6 }
 0x803   : > { %p2580_p1 = pneg %p2579_p0 }
 0x805   : > { %s2188_s20 = sand.u32 1, %s3276_s22  }
 0x806   : > { %s2189_s29 = scalar_lea.sflag [#allocation3], %s2188_s20 }
 0x807   : > { %2710 = dma.done.wait (%p2580_p1), %s2189_s29, 128  }
 0x808   : > { %2712 = vsyncadd (%p2580_p1), %s2189_s29, 4294967168  ;;  %s3278_s27 = sld [smem:[#allocation7_spill]]  ;;  %s3281_s24 = smov %s2719_s25 }
 0x809   : > { %s3279_s28 = sld [smem:[#allocation6_spill]] }
 0x80a   : > { %s3280_s26 = sld [smem:[#allocation8_spill]] }
 0x80e   : > { %p27_p2 = scmp.ge.s32.totalorder %s3278_s27, 4  }
 0x80f   : > { %s3282_s25 = smov %s3279_s28 }
 0x810   :  { %29 = sbr.rel (!%p27_p2) target bundleno = 9 (0x9), region = 123 }
 0x815   :  { %2194 = vsyncpa [#allocation3], 1 }
 0x816   :  { %2196 = vsyncpa [#allocation3 + $0x1], 1 }

</bundles_post_ra>
